<compile_context>
chip_gen: v7x
topology: tpu7x:2x2x1
jax: 0.10.0
libtpu: 0.0.40
codegen_flags: <defaults>
</compile_context>

<pallas_src>
import functools
import math

import jax
import jax.numpy as jnp
import numpy as np
from jax.experimental import pallas as pl
from jax.experimental.pallas import tpu as pltpu

_LANES = 128                 # TPU vreg lane width
_MAX_PACK_LANES = 512        # cap on the packed lane width (lcm packing)
_TARGET_TILE_BYTES = 2 << 20 # ~2 MiB per output block; x2 double-buffer << 16 MiB


def _round_up(x: int, m: int) -> int:
    return (x + m - 1) // m * m


def _pe_kernel(freq_ref, sub_ref, odd_ref, o_ref, *, pack):
    """Writes one (tile_rows, lanes) slab of the sinusoidal PE table.

    Flat table element r*lanes + l maps to
        position = r*pack + (l // d_model)      (l // d_model precomputed in sub_ref)
        feature  = l % d_model
    freq_ref[0, l] = exp(2*floor(feature/2) * -ln(10000)/d_model)
    odd_ref[0, l]  = 1.0 iff feature is odd.
    For pack == 1 the lane axis is the feature axis and sub_ref is irrelevant
    (its padded lanes are trimmed in the wrapper).
    """
    tile_rows = o_ref.shape[0]
    row0 = pl.program_id(0) * tile_rows
    row = (row0 + jax.lax.broadcasted_iota(jnp.int32, (tile_rows, 1), 0)).astype(jnp.float32)
    pos = row * float(pack) + sub_ref[...]          # (tile_rows, lanes)
    angle = pos * freq_ref[...]
    # Native cos for odd features -> exact PyTorch-buffer parity at any max_len
    # (the sin(x + pi/2) trick drifts by ~ulp(angle) for large positions).  The
    # doubled EUP push only matters on this one-time build, which is tiny.
    val = jnp.where(odd_ref[...] > 0.5, jnp.cos(angle), jnp.sin(angle))
    o_ref[...] = val.astype(o_ref.dtype)


def _build_pe_table(d_model: int, max_len: int, out_dtype=jnp.float32):
    assert d_model % 2 == 0, "d_model must be even (matches the PyTorch buffer build)"
    scale = -(math.log(10000.0) / float(d_model))
    itemsize = np.dtype(out_dtype).itemsize
    row_align = 8 * max(1, 4 // itemsize)           # 8 for f32, 16 for bf16

    # --- lane layout --------------------------------------------------------
    lcm = d_model * _LANES // math.gcd(d_model, _LANES)
    if d_model % _LANES == 0:
        lanes, pack = d_model, 1                    # feature axis already lane-dense
    elif lcm <= _MAX_PACK_LANES:
        lanes, pack = lcm, lcm // d_model           # pack `pack` positions per row
    else:
        lanes, pack = _round_up(d_model, _LANES), 1 # rare widths: pad feature axis
    rows = pl.cdiv(max_len * d_model, lanes) if pack > 1 else max_len

    # --- row tiling: byte-capped, sublane-aligned, >=2 tiles for v7x ---------
    bytes_per_row = lanes * itemsize
    tile_rows = max(row_align,
                    (_TARGET_TILE_BYTES // bytes_per_row) // row_align * row_align)
    if rows >= 2 * row_align:
        # at least two grid tiles so v7x's second TensorCore gets a share
        tile_rows = min(tile_rows, _round_up(pl.cdiv(rows, 2), row_align))
    tile_rows = min(tile_rows, _round_up(rows, row_align))
    rows_padded = _round_up(rows, tile_rows)
    grid = (rows_padded // tile_rows,)
    # Each block is <= ~2 MiB; double-buffered output + three (1, lanes) lane
    # tables stay far below every generation's scoped-VMEM default, so no
    # vmem_limit_bytes override is required.

    # --- host-side (1, lanes) lane tables (exp/div/mod done zero times on TPU) --
    lane = np.arange(lanes)
    feat = lane % d_model
    freq = np.exp((feat - (feat % 2)).astype(np.float32)
                  * np.float32(scale)).astype(np.float32)[None]
    sub = (lane // d_model).astype(np.float32)[None]
    odd = (feat % 2).astype(np.float32)[None]

    @jax.jit
    def build(freq, sub, odd):
        out = pl.pallas_call(
            functools.partial(_pe_kernel, pack=pack),
            out_shape=jax.ShapeDtypeStruct((rows_padded, lanes), out_dtype),
            grid=grid,
            in_specs=[pl.BlockSpec((1, lanes), lambda i: (0, 0))] * 3,
            out_specs=pl.BlockSpec((tile_rows, lanes), lambda i: (i, 0)),
            compiler_params=pltpu.CompilerParams(dimension_semantics=("parallel",)),
        )(freq, sub, odd)
        # Trim row/lane padding back to (1, max_len, d_model); fused under this jit.
        if pack > 1:
            pe2d = out.reshape(-1)[: max_len * d_model].reshape(max_len, d_model)
        else:
            pe2d = out[:max_len, :d_model]
        return pe2d[None]

    return build(jnp.asarray(freq), jnp.asarray(sub), jnp.asarray(odd))


@functools.lru_cache(maxsize=None)
def _pe_table(d_model: int, max_len: int, dtype_name: str = "float32"):
    # Built once per (d_model, max_len, dtype), like the PyTorch registered buffer.
    return jax.block_until_ready(_build_pe_table(d_model, max_len, np.dtype(dtype_name)))


@functools.lru_cache(maxsize=None)
def _pe_slice(d_model: int, max_len: int, seq_len: int, dtype_name: str = "float32"):
    # Cache the (1, seq_len, d_model) view so forward() never re-copies per call.
    pe = _pe_table(d_model, max_len, dtype_name)
    return jax.block_until_ready(pe[:, :seq_len])


def positional_encoding_forward(x, max_len: int = 200):
    """Equivalent of PositionalEncoding(d_model, max_len).forward(x)."""
    seq_len, d_model = int(x.shape[1]), int(x.shape[2])
    assert seq_len <= max_len, "sequence longer than max_len"
    # NOTE: like the PyTorch module, forward never reads x's values; hot paths
    # should fuse `x + pe` under their own jit so pe never takes an extra HBM trip.
    return _pe_slice(d_model, max_len, seq_len)


class PositionalEncoding:
    """Drop-in mirror of the PyTorch module: buffer built once, forward slices."""

    def __init__(self, d_model, max_len=200, dtype=jnp.float32):
        self.d_model, self.max_len = int(d_model), int(max_len)
        self.dtype_name = np.dtype(dtype).name
        self.pe = _pe_table(self.d_model, self.max_len, self.dtype_name)

    def __call__(self, x):
        return _pe_slice(self.d_model, self.max_len, int(x.shape[1]), self.dtype_name)


def _reference_pe(seq_len, d_model, max_len=200):
    """Pure-numpy replica of the PyTorch __init__ buffer, for verification."""
    pe = np.zeros((max_len, d_model), dtype=np.float32)
    position = np.arange(0, max_len, dtype=np.float32)[:, None]
    div_term = np.exp(np.arange(0, d_model, 2, dtype=np.float32)
                      * -(math.log(10000.0) / d_model))
    pe[:, 0::2] = np.sin(position * div_term)
    pe[:, 1::2] = np.cos(position * div_term)
    return pe[None, :seq_len, :]


if __name__ == "__main__":
    key = jax.random.PRNGKey(0)

    # Small shape consistent with the module: batch=2, seq=8, d_model=32
    # (exercises the lane-dense packed layout, lanes=128, pack=4).
    batch, seq, d_model = 2, 8, 32
    x = jax.random.normal(key, (batch, seq, d_model), dtype=jnp.float32)
    out = jax.block_until_ready(positional_encoding_forward(x, max_len=200))
    assert out.shape == (1, seq, d_model), out.shape
    assert out.dtype == jnp.float32
    np.testing.assert_allclose(np.asarray(out), _reference_pe(seq, d_model),
                               rtol=1e-5, atol=2e-5)

    # Exercise the lcm-packed path (d_model=96 -> lanes=384, pack=4, zero waste).
    x3 = jax.random.normal(key, (2, 16, 96), dtype=jnp.float32)
    out3 = jax.block_until_ready(positional_encoding_forward(x3, max_len=200))
    np.testing.assert_allclose(np.asarray(out3), _reference_pe(16, 96),
                               rtol=1e-5, atol=2e-5)

    # Exercise the natural lane-dense path (d_model multiple of 128, pack=1).
    x2 = jax.random.normal(key, (2, 16, 128), dtype=jnp.float32)
    out2 = jax.block_until_ready(positional_encoding_forward(x2, max_len=200))
    np.testing.assert_allclose(np.asarray(out2), _reference_pe(16, 128),
                               rtol=1e-5, atol=2e-5)

    # Class wrapper (buffer built once, forward slices; slice is cached).
    mod = PositionalEncoding(d_model, max_len=200)
    out_mod = jax.block_until_ready(mod(x))
    np.testing.assert_allclose(np.asarray(out_mod), _reference_pe(seq, d_model),
                               rtol=1e-5, atol=2e-5)

    print("KERNEL_OK")
</pallas_src>

<mosaic_0001>
module attributes {stable_mosaic.version = 11 : i64} {
  func.func @_pe_kernel(%arg0: i32, %arg1: memref<1x128xf32, #tpu.memory_space<vmem>>, %arg2: memref<1x128xf32, #tpu.memory_space<vmem>>, %arg3: memref<1x128xf32, #tpu.memory_space<vmem>>, %arg4: memref<32x128xf32, #tpu.memory_space<vmem>>) attributes {dimension_semantics = [#tpu.dimension_semantics<parallel>], iteration_bounds = array<i64: 2>, scalar_prefetch = 0 : i64, scratch_operands = 0 : i64, tpu.core_type = #tpu.core_type<tc>, window_params = [{pipeline_mode = #tpu.pipeline_mode<synchronous>, transform_indices = @transform_0, window_bounds = array<i64: 1, 128>}, {pipeline_mode = #tpu.pipeline_mode<synchronous>, transform_indices = @transform_1, window_bounds = array<i64: 1, 128>}, {pipeline_mode = #tpu.pipeline_mode<synchronous>, transform_indices = @transform_2, window_bounds = array<i64: 1, 128>}, {transform_indices = @transform_3, window_bounds = array<i64: 32, 128>}]} {
    %c32_i32 = arith.constant 32 : i32
    %0 = arith.muli %arg0, %c32_i32 : i32
    %1 = tpu.iota {dimensions = array<i32: 0>} : vector<32x1xi32>
    %2 = vector.broadcast %0 : i32 to vector<32x1xi32>
    %3 = arith.addi %2, %1 : vector<32x1xi32>
    %4 = arith.sitofp %3 : vector<32x1xi32> to vector<32x1xf32>
    %cst = arith.constant 4.000000e+00 : f32
    %5 = vector.broadcast %cst : f32 to vector<32x1xf32>
    %6 = arith.mulf %4, %5 : vector<32x1xf32>
    %c0 = arith.constant 0 : index
    %c0_0 = arith.constant 0 : index
    %7 = vector.load %arg2[%c0, %c0_0] : memref<1x128xf32, #tpu.memory_space<vmem>>, vector<1x128xf32>
    %8 = vector.broadcast %6 : vector<32x1xf32> to vector<32x128xf32>
    %9 = vector.broadcast %7 : vector<1x128xf32> to vector<32x128xf32>
    %10 = arith.addf %8, %9 : vector<32x128xf32>
    %c0_1 = arith.constant 0 : index
    %c0_2 = arith.constant 0 : index
    %11 = vector.load %arg1[%c0_1, %c0_2] : memref<1x128xf32, #tpu.memory_space<vmem>>, vector<1x128xf32>
    %12 = vector.broadcast %11 : vector<1x128xf32> to vector<32x128xf32>
    %13 = arith.mulf %10, %12 : vector<32x128xf32>
    %c0_3 = arith.constant 0 : index
    %c0_4 = arith.constant 0 : index
    %14 = vector.load %arg3[%c0_3, %c0_4] : memref<1x128xf32, #tpu.memory_space<vmem>>, vector<1x128xf32>
    %cst_5 = arith.constant 5.000000e-01 : f32
    %15 = vector.broadcast %cst_5 : f32 to vector<1x128xf32>
    %16 = arith.cmpf ogt, %14, %15 : vector<1x128xf32>
    %17 = math.cos %13 : vector<32x128xf32>
    %18 = math.sin %13 : vector<32x128xf32>
    %19 = vector.shape_cast %16 : vector<1x128xi1> to vector<1x128xi1>
    %20 = vector.broadcast %19 : vector<1x128xi1> to vector<32x128xi1>
    %21 = arith.select %20, %17, %18 : vector<32x128xi1>, vector<32x128xf32>
    %c0_6 = arith.constant 0 : index
    %c0_7 = arith.constant 0 : index
    %22 = vector.load %arg4[%c0_6, %c0_7] : memref<32x128xf32, #tpu.memory_space<vmem>>, vector<32x128xf32>
    tpu.vector_store %arg4[%c0_6, %c0_7], %21 {strides = array<i32>} : memref<32x128xf32, #tpu.memory_space<vmem>>, vector<32x128xf32>,
    return
  }
  func.func @transform_0(%arg0: i32) -> (i32, i32) {
    %c0_i32 = arith.constant 0 : i32
    %c0_i32_0 = arith.constant 0 : i32
    %c0_i32_1 = arith.constant 0 : i32
    return %c0_i32, %c0_i32_0 : i32, i32
  }
  func.func @transform_1(%arg0: i32) -> (i32, i32) {
    %c0_i32 = arith.constant 0 : i32
    %c0_i32_0 = arith.constant 0 : i32
    %c0_i32_1 = arith.constant 0 : i32
    return %c0_i32, %c0_i32_0 : i32, i32
  }
  func.func @transform_2(%arg0: i32) -> (i32, i32) {
    %c0_i32 = arith.constant 0 : i32
    %c0_i32_0 = arith.constant 0 : i32
    %c0_i32_1 = arith.constant 0 : i32
    return %c0_i32, %c0_i32_0 : i32, i32
  }
  func.func @transform_3(%arg0: i32) -> (i32, i32) {
    %c0_i32 = arith.constant 0 : i32
    %c0_i32_0 = arith.constant 0 : i32
    return %arg0, %c0_i32 : i32, i32
  }
}

</mosaic_0001>

<bundles_post_ra>
// kernel: build.1
= control target key start
LH: loop header
LB: loop body
LE: loop exit
PB: predicated region body
PF: predicated region fallthrough
CT: control target
= control target key end

     0   :  { %8 = vsyncpa [#allocation3], 0  ;;  %s1277_s12 = smov 0   ;;  %s1698_s0 = inlined_call_operand.hbm [shape: f32[1,128], index: 0, kind: input, shape index: {}]   ;;  %s1699_s1 = inlined_call_operand.vmem [shape: f32[1,128], index: 1, kind: input, shape index: {}]   ;;  %s1700_s2 = inlined_call_operand.vmem [shape: f32[1,128], index: 2, kind: input, shape index: {}]   ;;  %s1701_s3 = inlined_call_operand.vmem [shape: f32[64,128], index: 3, kind: output, shape index: {}]  }
   0x1 LB: > { %s1283_s13 = sadd.s32 4294967295, %s1247_s12   ;;  %p1108_p0 = scmp.ge.s32.totalorder %s1247_s12, 1  ;;  %s1247_s12 = sphi %s1277_s12, %s14_s12  }
   0x2   : > { %p108_p1 = scmp.lt.s32.totalorder %s1247_s12, 3  ;;  %p1702_p3 = scmp.eq.s32.totalorder %s1283_s13, 0 }
   0x3   : > { %s1249_s15 = smov [#allocation2]   ;;  %s1209_s20 = scalar_lea.hbm %s1698_s0, 16 }
   0x4   : > { %p1287_p2 = pnand %p1108_p0, %p108_p1  ;;  %s121_s16 = sshll.u32 %s1249_s15, 4  ;;  %s122_s16 = int_to_ptr.vmem [resolvable:$true] %s121_s16 }
   0x5   : > { %p1210_p6 = scmp.ne.s32.totalorder %s1698_s0, %s1209_s20  ;;  %p1216_p10 = scmp.lt.u32.totalorder %s1209_s20, %s1698_s0 }
   0x6   : > { %s1704_s14 = scalar_select %p1287_p2, 1, 0 }
   0x7   : > { %p1171_p4 = pneg %p1287_p2 }
   0x9   : > { %p1296_p5 = pnand %p1702_p3, %p1171_p4 }
   0xb   : > { %p1211_p7 = pneg %p1296_p5 }
   0xd   : > { %p1212_p8 = pnand %p1211_p7, %p1210_p6 }
   0xf   : > { %p1213_p9 = pneg %p1212_p8 }
  0x11   : > { %p1218_p11 = pnand %p1216_p10, %p1213_p9 }
  0x13   : > { %1221 = shalt.err (!%p1218_p11)
}
  0x14   : > { %s1222_s25 = scalar_lea.vmem %s122_s16, 16  ;;  %s1229_s26 = scalar_lea.vmem %s122_s16, 32 }
  0x15   : > { %p1223_p12 = scmp.ne.s32.totalorder %s122_s16, %s1222_s25  ;;  %p1230_p1 = scmp.lt.s32.totalorder %s122_s16, %s122_s16 }
  0x16   : > { %p1231_p4 = scmp.lt.s32.totalorder %s1229_s26, %s1222_s25 }
  0x17   : > { %p1225_p13 = pnand %p1223_p12, %p1211_p7 }
  0x18   : > { %p1232_p3 = por %p1231_p4, %p1230_p1 }
  0x19   : > { %p1226_p0 = pneg %p1225_p13 }
  0x1b   : > { %p1233_p2 = pnand %p1232_p3, %p1226_p0 }
  0x1d   : > { %1236 = shalt.err (!%p1233_p2)
}
  0x1e   : > { %1174 = dma.hbm_to_vmem [thread:$0]  (!%p1296_p5), %s1698_s0, 16, %s122_s16, [#allocation3]  }
  0x1f   : > { %p1706_p6 = scmp.ne.s32.totalorder %s1704_s14, 0 }
  0x20   : > { %p1707_p8 = scmp.eq.s32.totalorder (!%p1706_p6), %s1283_s13, 0 }
  0x21   : > { %140 = sbr.rel (%p1706_p6) target bundleno = 195 (0xc3), region = 32 }
  0x28   : > { %1242 = dma.done.wait (%p1707_p8), [#allocation3], 16   ;;  %p1708_p7 = pmov %p1707_p8 }
  0x29   : > { %s1114_s29 = sshll.u32 %s1283_s13, 5  ;;  %v166_v0 = vlaneseq  ;;  %v1115_v10 = vld [vmem:[%s1699_s1] ss:$0 sm:$0xff]  ;;  %v1250_v54 = vmov 683565275   ;;  %s1112_s7 = sshll.u32 %s1283_s13, 2 }
  0x2a   : > { %1244 = vsyncadd (%p1708_p7), [#allocation3], 4294967280  ;;  %v171_v1 = vstv %s1114_s29  ;;  %v1116_v15 = vld [vmem:[#allocation2] ss:$0 sm:$0xff]  ;;  %v1251_v56 = vmov 2475754826  }
  0x2b   : > { %v1323_v2 = vshrl.u32 %v166_v0, 7  ;;  %v1252_v58 = vmov 2131351028   ;;  %v1253_v60 = vmov 2102212464   ;;  %p1613_p2 = scmp.lt.s32.totalorder %s1112_s7, 7 }
  0x2c   : > { %v1254_v62 = vmov 920167782  }
  0x2d   : > { %v168_v3 = vadd.s32 8, %v1323_v2  ;;  %v169_v4 = vadd.s32 16, %v1323_v2  ;;  %v172_v5 = vadd.s32 %v171_v1, %v1323_v2  ;;  %v170_v6 = vadd.s32 24, %v1323_v2  ;;  %s1715_s7 = smov (!%p1613_p2, %s1112_s7), 7 }
  0x2e   : > { %s1113_s9 = sshll.u32 %s1715_s7, 3 }
  0x2f   : > { %v173_v7 = vadd.s32 %v171_v1, %v168_v3  ;;  %v174_v8 = vadd.s32 %v171_v1, %v169_v4  ;;  %v176_v9 = vcvt.s32.f32 %v172_v5  ;;  %v175_v14 = vadd.s32 %v171_v1, %v170_v6  ;;  %s1657_s13 = scalar_lea.vmem %s1701_s3, %s1113_s9 }
  0x31   : > { %v177_v11 = vcvt.s32.f32 %v173_v7  ;;  %v178_v12 = vcvt.s32.f32 %v174_v8  ;;  %v180_v13 = vmul.f32 4.0, %v176_v9  ;;  %v179_v22 = vcvt.s32.f32 %v175_v14 }
  0x32   : > { %v1255_v7 = vmov 1326507024  }
  0x33   : > { %v181_v16 = vmul.f32 4.0, %v177_v11  ;;  %v182_v17 = vmul.f32 4.0, %v178_v12  ;;  %v191_v18 = vadd.f32 %v1115_v10, %v180_v13  ;;  %v183_v28 = vmul.f32 4.0, %v179_v22 }
  0x35   : > { %v192_v19 = vadd.f32 %v1115_v10, %v181_v16  ;;  %v193_v20 = vadd.f32 %v1115_v10, %v182_v17  ;;  %v1332_v21 = vmul.f32 %v1116_v15, %v191_v18  ;;  %v194_v36 = vadd.f32 %v1115_v10, %v183_v28 }
  0x37   : > { %v1334_v23 = vmul.f32 %v1116_v15, %v192_v19  ;;  %v208_v24 = vand.u32 2147483647, %v1332_v21  ;;  %v1337_v25 = vmul.f32 %v1116_v15, %v193_v20  ;;  %v211_v26 = vand.u32 2139095040, %v1332_v21 }
  0x38   : > { %v1348_v46 = vmul.f32 %v1116_v15, %v194_v36  ;;  %vm210_vm13 = vcmp.lt.s32.totalorder %v1332_v21, 0 }
  0x39   : > { %v311_v27 = vand.u32 2147483647, %v1334_v23  ;;  %v212_v29 = vshrl.u32 %v211_v26, 23  ;;  %v314_v30 = vand.u32 2139095040, %v1334_v23  ;;  %v215_v31 = vand.u32 8388607, %v208_v24 }
  0x3a   : > { %v417_v35 = vand.u32 2139095040, %v1337_v25  ;;  %v414_v42 = vand.u32 2147483647, %v1337_v25 }
  0x3b   : > { %v318_v32 = vand.u32 8388607, %v311_v27  ;;  %v1117_v33 = vadd.s32 4294967169, %v212_v29  ;;  %v315_v34 = vshrl.u32 %v314_v30, 23  ;;  %v216_v40 = vor.u32 8388608, %v215_v31 }
  0x3c   : > { %v418_v39 = vshrl.u32 %v417_v35, 23  ;;  %v1356_v51 = vand.u32 8388607, %v414_v42 }
  0x3d   : > { %v218_v37 = vadd.s32 1, %v1117_v33  ;;  %v1121_v38 = vadd.s32 4294967169, %v315_v34  ;;  %v319_v41 = vor.u32 8388608, %v318_v32  ;;  %v1350_v49 = vshll.u32 %v216_v40, 8 }
  0x3e   : > { %v1125_v44 = vadd.s32 4294967169, %v418_v39 }
  0x3f   : > { %vm219_vm0 = vcmp.gt.s32.totalorder %v218_v37, 0  ;;  %v321_v43 = vadd.s32 1, %v1121_v38  ;;  %v1352_v50 = vshll.u32 %v319_v41, 8 }
  0x40   : > { %v220_v45 = vsel %vm219_vm0, %v218_v37, 0  ;;  %v1358_v52 = vadd.s32 1, %v1125_v44 }
  0x41   : > { %v221_v47 = vshrl.u32 %v220_v45, 5  ;;  %v222_v48 = vand.u32 31, %v220_v45  ;;  %vm322_vm1 = vcmp.gt.s32.totalorder %v321_v43, 0 }
  0x42   : > { %v323_v0 = vsel %vm322_vm1, %v321_v43, 0  ;;  %vm425_vm8 = vcmp.gt.s32.totalorder %v1358_v52, 0  ;;  %vm1466_vm1 = vcmp.le.f32.partialorder %v208_v24, 0.7853982 }
  0x43   : > { %v223_v53 = vsub.s32 32, %v222_v48  ;;  %v225_v55 = vshll.u32 %v1250_v54, %v222_v48  ;;  %v228_v57 = vshll.u32 %v1251_v56, %v222_v48  ;;  %v231_v59 = vshll.u32 %v1252_v58, %v222_v48 }
  0x44   : > { %v234_v61 = vshll.u32 %v1253_v60, %v222_v48  ;;  %v237_v63 = vshll.u32 %v1254_v62, %v222_v48  ;;  %vm240_vm2 = vcmp.lt.s32.totalorder %v221_v47, 1  ;;  %vm241_vm3 = vcmp.lt.s32.totalorder %v221_v47, 2 }
  0x45   : > { %v224_v1 = vshrl.u32 %v1250_v54, %v223_v53  ;;  %v226_v3 = vshrl.u32 %v1251_v56, %v223_v53  ;;  %v229_v4 = vshrl.u32 %v1252_v58, %v223_v53  ;;  %v232_v5 = vshrl.u32 %v1253_v60, %v223_v53 }
  0x46   : > { %v235_v6 = vshrl.u32 %v1254_v62, %v223_v53  ;;  %v238_v8 = vshrl.u32 %v1255_v7, %v223_v53  ;;  %vm242_vm4 = vcmp.lt.s32.totalorder %v221_v47, 3  ;;  %vm243_vm5 = vcmp.lt.s32.totalorder %v221_v47, 4 }
  0x47   : > { %v227_v9 = vor.u32 %v226_v3, %v225_v55  ;;  %v230_v10 = vor.u32 %v229_v4, %v228_v57  ;;  %v233_v11 = vor.u32 %v232_v5, %v231_v59  ;;  %v324_v14 = vshrl.u32 %v323_v0, 5 }
  0x48   : > { %v236_v12 = vor.u32 %v235_v6, %v234_v61  ;;  %v239_v13 = vor.u32 %v238_v8, %v237_v63  ;;  %v325_v15 = vand.u32 31, %v323_v0 }
  0x49   : > { %v244_v16 = vsel %vm240_vm2, %v224_v1, %v227_v9  ;;  %v245_v17 = vsel %vm243_vm5, %v233_v11, 2102212464  ;;  %v248_v18 = vsel %vm240_vm2, %v227_v9, %v230_v10  ;;  %v252_v19 = vsel %vm240_vm2, %v230_v10, %v233_v11 }
  0x4a   : > { %v246_v20 = vsel %vm242_vm4, %v230_v10, %v245_v17  ;;  %v249_v22 = vsel %vm243_vm5, %v236_v12, 920167782  ;;  %v253_v26 = vsel %vm243_vm5, %v239_v13, 1326507024  ;;  %v326_v28 = vsub.s32 32, %v325_v15 }
  0x4b   : > { %v247_v29 = vsel %vm241_vm3, %v244_v16, %v246_v20  ;;  %v250_v30 = vsel %vm242_vm4, %v233_v11, %v249_v22  ;;  %v254_v31 = vsel %vm242_vm4, %v236_v12, %v253_v26  ;;  %v328_v32 = vshll.u32 %v1250_v54, %v325_v15 }
  0x4c   : > { %v251_v33 = vsel %vm241_vm3, %v248_v18, %v250_v30  ;;  %v255_v34 = vsel %vm241_vm3, %v252_v19, %v254_v31  ;;  %v263_v35 = vmul.u32 %v1350_v49, %v247_v29  ;;  %v327_v36 = vshrl.u32 %v1250_v54, %v326_v28 }
  0x4d   : > { %v1385_v37 = vmul.u32.u64.low %v1350_v49, %v255_v34  ;;  %v1386_v38 = vmul.u32.u64.high %v1350_v49, %v255_v34, %v1385_v37  ;;  %v1389_v39 = vmul.u32.u64.low %v1350_v49, %v251_v33  ;;  %v1390_v40 = vmul.u32.u64.high %v1350_v49, %v251_v33, %v1389_v39 }
  0x4e   : > { %v329_v41 = vshrl.u32 %v1251_v56, %v326_v28  ;;  %v331_v43 = vshll.u32 %v1251_v56, %v325_v15  ;;  %v332_v44 = vshrl.u32 %v1252_v58, %v326_v28  ;;  %v334_v45 = vshll.u32 %v1252_v58, %v325_v15 }
  0x4f   : > { %v335_v47 = vshrl.u32 %v1253_v60, %v326_v28  ;;  %v337_v48 = vshll.u32 %v1253_v60, %v325_v15  ;;  %v338_v53 = vshrl.u32 %v1254_v62, %v326_v28  ;;  %v340_v55 = vshll.u32 %v1254_v62, %v325_v15 }
  0x50   : > { %v330_v57 = vor.u32 %v329_v41, %v328_v32  ;;  %v333_v49 = vor.u32 %v332_v44, %v331_v43  ;;  %v341_v59 = vshrl.u32 %v1255_v7, %v326_v28  ;;  %vm343_vm6 = vcmp.lt.s32.totalorder %v324_v14, 1 }
  0x51   : > { %vm265_vm7 = vc.u32 %v1386_v38, %v1389_v39  ;;  %v266_v61 = vadd.s32 1, %v1390_v40  ;;  %v336_v63 = vor.u32 %v335_v47, %v334_v45  ;;  %v339_v0 = vor.u32 %v338_v53, %v337_v48 }
  0x52   : > { %v342_v1 = vor.u32 %v341_v59, %v340_v55  ;;  %vm344_vm9 = vcmp.lt.s32.totalorder %v324_v14, 2  ;;  %vm345_vm10 = vcmp.lt.s32.totalorder %v324_v14, 3  ;;  %vm346_vm11 = vcmp.lt.s32.totalorder %v324_v14, 4 }
  0x53   : > { %v267_v3 = vsel %vm265_vm7, %v266_v61, %v1390_v40  ;;  %v347_v4 = vsel %vm343_vm6, %v327_v36, %v330_v57  ;;  %v351_v5 = vsel %vm343_vm6, %v330_v57, %v333_v49  ;;  %v348_v8 = vsel %vm346_vm11, %v336_v63, 2102212464 }
  0x54   : > { %v268_v6 = vadd.s32 %v267_v3, %v263_v35  ;;  %v352_v9 = vsel %vm346_vm11, %v339_v0, 920167782  ;;  %v355_v10 = vsel %vm343_vm6, %v333_v49, %v336_v63  ;;  %v349_v11 = vsel %vm345_vm10, %v333_v49, %v348_v8 }
  0x55   : > { %v353_v12 = vsel %vm345_vm10, %v336_v63, %v352_v9  ;;  %v356_v13 = vsel %vm346_vm11, %v342_v1, 1326507024  ;;  %v517_v15 = vand.u32 2147483647, %v1348_v46  ;;  %v426_v19 = vsel %vm425_vm8, %v1358_v52, 0 }
  0x56   : > { %v269_v16 = vadd.s32 536870912, %v268_v6  ;;  %v354_v17 = vsel %vm344_vm9, %v351_v5, %v353_v12  ;;  %v357_v18 = vsel %vm345_vm10, %v339_v0, %v356_v13  ;;  %v350_v20 = vsel %vm344_vm9, %v347_v4, %v349_v11 }
  0x57   : > { %v358_v22 = vsel %vm344_vm9, %v355_v10, %v357_v18  ;;  %v1418_v26 = vmul.u32.u64.low %v1352_v50, %v354_v17  ;;  %v1419_v28 = vmul.u32.u64.high %v1352_v50, %v354_v17, %v1418_v26  ;;  %v520_v32 = vand.u32 2139095040, %v1348_v46 }
  0x58   : > { %v1422_v29 = vshrl.u32 %v269_v16, 30  ;;  %v1425_v30 = vmul.u32.u64.low %v1352_v50, %v358_v22  ;;  %v1426_v31 = vmul.u32.u64.high %v1352_v50, %v358_v22, %v1425_v30  ;;  %v422_v33 = vor.u32 8388608, %v1356_v51 }
  0x59   : > { %v428_v52 = vand.u32 31, %v426_v19  ;;  %v366_v14 = vmul.u32 %v1352_v50, %v350_v20  ;;  %v369_v35 = vadd.s32 1, %v1419_v28  ;;  %v521_v40 = vshrl.u32 %v520_v32, 23 }
  0x5a   : > { %v271_v34 = vshll.u32 %v1422_v29, 30  ;;  %vm368_vm12 = vc.u32 %v1426_v31, %v1418_v26  ;;  %v1439_v41 = vand.u32 8388607, %v517_v15  ;;  %v1444_v50 = vshll.u32 %v422_v33, 8 }
  0x5b   : > { %v429_v36 = vsub.s32 32, %v428_v52  ;;  %v370_v51 = vsel %vm368_vm12, %v369_v35, %v1419_v28  ;;  %v431_v43 = vshll.u32 %v1250_v54, %v428_v52  ;;  %v427_v48 = vshrl.u32 %v426_v19, 5 }
  0x5c   : > { %v1433_v37 = vsub.s32 %v268_v6, %v271_v34  ;;  %v371_v47 = vadd.s32 %v370_v51, %v366_v14  ;;  %v434_v53 = vshll.u32 %v1251_v56, %v428_v52  ;;  %v437_v57 = vshll.u32 %v1252_v58, %v428_v52 }
  0x5d   : > { %v432_v44 = vshrl.u32 %v1251_v56, %v429_v36  ;;  %v435_v55 = vshrl.u32 %v1252_v58, %v429_v36  ;;  %v438_v49 = vshrl.u32 %v1253_v60, %v429_v36  ;;  %v440_v59 = vshll.u32 %v1253_v60, %v428_v52 }
  0x5e   : > { %v274_v45 = vsub.s32 0, %v1433_v37  ;;  %v264_v61 = vadd.s32 %v1389_v39, %v1386_v38  ;;  %v1129_v0 = vadd.s32 4294967169, %v521_v40  ;;  %v525_v1 = vor.u32 8388608, %v1439_v41 }
  0x5f   : > { %v372_v3 = vadd.s32 536870912, %v371_v47  ;;  %v430_v4 = vshrl.u32 %v1250_v54, %v429_v36  ;;  %v433_v5 = vor.u32 %v432_v44, %v431_v43  ;;  %v441_v6 = vshrl.u32 %v1254_v62, %v429_v36 }
  0x60   : > { %v1118_v63 = vmin.u32 %v274_v45, %v1433_v37  ;;  %v439_v9 = vor.u32 %v438_v49, %v437_v57  ;;  %v443_v10 = vshll.u32 %v1254_v62, %v428_v52  ;;  %v444_v11 = vshrl.u32 %v1255_v7, %v429_v36 }
  0x61   : > { %v373_v12 = vshrl.u32 %v372_v3, 30  ;;  %v436_v13 = vor.u32 %v435_v55, %v434_v53  ;;  %v442_v38 = vor.u32 %v441_v6, %v440_v59  ;;  %vm449_vm14 = vcmp.lt.s32.totalorder %v427_v48, 4 }
  0x62   : > { %v276_v8 = vclz %v1118_v63  ;;  %v294_v16 = vsub.s32 4, %v1422_v29  ;;  %vm446_vm15 = vcmp.lt.s32.totalorder %v427_v48, 1  ;;  %v451_v17 = vsel %vm449_vm14, %v439_v9, 2102212464 }
  0x63   : > { %v374_v18 = vshll.u32 %v373_v12, 30  ;;  %v445_v19 = vor.u32 %v444_v11, %v443_v10  ;;  %vm448_vm0 = vcmp.lt.s32.totalorder %v427_v48, 3  ;;  %v455_v20 = vsel %vm449_vm14, %v442_v38, 920167782 }
  0x64   : > { %v1119_v39 = vadd.s32 4294967294, %v276_v8  ;;  %vm447_vm3 = vcmp.lt.s32.totalorder %v427_v48, 2  ;;  %v450_v28 = vsel %vm446_vm15, %v430_v4, %v433_v5  ;;  %v527_v30 = vadd.s32 1, %v1129_v0 }
  0x65   : > { %vm313_vm4 = vcmp.lt.s32.totalorder %v1334_v23, 0  ;;  %v1472_v33 = vsub.s32 %v371_v47, %v374_v18  ;;  %v452_v52 = vsel %vm448_vm0, %v436_v13, %v451_v17  ;;  %v454_v34 = vsel %vm446_vm15, %v433_v5, %v436_v13 }
  0x66   : > { %vm1120_vm2 = vcmp.lt.s32.totalorder %v1119_v39, 0  ;;  %v456_v36 = vsel %vm448_vm0, %v439_v9, %v455_v20  ;;  %v295_v40 = vsel %vm210_vm13, %v294_v16, %v1422_v29  ;;  %v458_v51 = vsel %vm446_vm15, %v436_v13, %v439_v9 }
  0x67   : > { %v279_v32 = vsel %vm1120_vm2, 0, %v1119_v39  ;;  %v377_v41 = vsub.s32 0, %v1472_v33  ;;  %v459_v43 = vsel %vm449_vm14, %v445_v19, 1326507024  ;;  %vm528_vm5 = vcmp.gt.s32.totalorder %v527_v30, 0 }
  0x68   : > { %v280_v14 = vsub.s32 32, %v279_v32  ;;  %v281_v24 = vshll.u32 %v1433_v37, %v279_v32  ;;  %v284_v35 = vsub.s32 4294967266, %v279_v32  ;;  %v460_v47 = vsel %vm448_vm0, %v442_v38, %v459_v43 }
  0x69   : > { %v1122_v37 = vmin.u32 %v377_v41, %v1472_v33  ;;  %v397_v53 = vsub.s32 4, %v373_v12  ;;  %v453_v55 = vsel %vm447_vm3, %v450_v28, %v452_v52  ;;  %v457_v57 = vsel %vm447_vm3, %v454_v34, %v456_v36 }
  0x6a   : > { %v282_v44 = vshrl.u32 %v264_v61, %v280_v14  ;;  %v285_v45 = vadd.s32 127, %v284_v35  ;;  %v461_v59 = vsel %vm447_vm3, %v458_v51, %v460_v47  ;;  %v529_v63 = vsel %vm528_vm5, %v527_v30, 0 }
  0x6b   : > { %v379_v0 = vclz %v1122_v37  ;;  %v1490_v3 = vmul.u32.u64.low %v1444_v50, %v461_v59  ;;  %v1491_v61 = vmul.u32.u64.high %v1444_v50, %v461_v59, %v1490_v3  ;;  %v1493_v4 = vshrl.u32 %v529_v63, 5 }
  0x6c   : > { %v283_v49 = vor.u32 %v282_v44, %v281_v24  ;;  %v286_v29 = vshll.u32 %v285_v45, 23  ;;  %v1496_v8 = vmul.u32.u64.low %v1444_v50, %v457_v57  ;;  %v1497_v9 = vmul.u32.u64.high %v1444_v50, %v457_v57, %v1496_v8 }
  0x6d   : > { %v297_v10 = vsel %vm1466_vm1, 0, %v295_v40  ;;  %v1123_v48 = vadd.s32 4294967294, %v379_v0  ;;  %v531_v11 = vand.u32 31, %v529_v63  ;;  %v1502_v13 = vshll.u32 %v525_v1, 8 }
  0x6e   : > { %v287_v5 = vor.u32 4788187, %v286_v29  ;;  %v290_v6 = vcvt.s32.f32 %v283_v49  ;;  %v1504_v39 = vand.u32 3, %v297_v10  ;;  %v367_v16 = vadd.s32 %v1418_v26, %v1426_v31 }
  0x6f   : > { %v1510_v17 = vsel %vm313_vm4, %v397_v53, %v373_v12  ;;  %vm1124_vm6 = vcmp.lt.s32.totalorder %v1123_v48, 0  ;;  %v469_v18 = vmul.u32 %v1444_v50, %v453_v55  ;;  %vm471_vm7 = vc.u32 %v1491_v61, %v1496_v8 }
  0x70   : > { %v288_v38 = vand.u32 2147483647, %v287_v5  ;;  %v532_v19 = vsub.s32 32, %v531_v11  ;;  %v382_v1 = vsel %vm1124_vm6, 0, %v1123_v48  ;;  %v472_v28 = vadd.s32 1, %v1497_v9 }
  0x71   : > { %vm552_vm8 = vcmp.lt.s32.totalorder %v1493_v4, 4  ;;  %v383_v30 = vsub.s32 32, %v382_v1  ;;  %v384_v26 = vshll.u32 %v1472_v33, %v382_v1  ;;  %v387_v31 = vsub.s32 4294967266, %v382_v1 }
  0x72   : > { %v291_v20 = vmul.f32 %v290_v6, %v288_v38  ;;  %v534_v12 = vshll.u32 %v1250_v54, %v531_v11  ;;  %v473_v52 = vsel %vm471_vm7, %v472_v28, %v1497_v9  ;;  %v533_v50 = vshrl.u32 %v1250_v54, %v532_v19  ;;  %v1565_v38 = vld [vmem:[%s1700_s2] sm:$0x1] }
  0x73   : > { %v535_v34 = vshrl.u32 %v1251_v56, %v532_v19  ;;  %v385_v14 = vshrl.u32 %v367_v16, %v383_v30  ;;  %v388_v24 = vadd.s32 127, %v387_v31  ;;  %v474_v35 = vadd.s32 %v473_v52, %v469_v18 }
  0x74   : > { %v292_v32 = vxor.u32 2147483648, %v291_v20  ;;  %v537_v36 = vshll.u32 %v1251_v56, %v531_v11  ;;  %v538_v33 = vshrl.u32 %v1252_v58, %v532_v19  ;;  %v540_v41 = vshll.u32 %v1252_v58, %v531_v11 }
  0x75   : > { %v541_v51 = vshrl.u32 %v1253_v60, %v532_v19  ;;  %vm1533_vm9 = vcmp.le.f32.partialorder %v311_v27, 0.7853982  ;;  %v386_v56 = vor.u32 %v385_v14, %v384_v26  ;;  %v389_v44 = vshll.u32 %v388_v24, 23 }
  0x76   : > { %v293_v40 = vsel %vm210_vm13, %v292_v32, %v291_v20  ;;  %v475_v45 = vadd.s32 536870912, %v474_v35  ;;  %v536_v47 = vor.u32 %v535_v34, %v534_v12  ;;  %v543_v58 = vshll.u32 %v1253_v60, %v531_v11 }
  0x77   : > { %v296_v54 = vsel %vm1466_vm1, %v1332_v21, %v293_v40  ;;  %v542_v37 = vor.u32 %v541_v51, %v540_v41  ;;  %v390_v53 = vor.u32 4788187, %v389_v44  ;;  %v393_v55 = vcvt.s32.f32 %v386_v56 }
  0x78   : > { %1193 = vcosq.f32 %v296_v54  ;;  %v1538_v57 = vshrl.u32 %v475_v45, 30  ;;  %v539_v22 = vor.u32 %v538_v33, %v537_v36  ;;  %v544_v49 = vshrl.u32 %v1254_v62, %v532_v19 }
  0x79   : > { %1195 = vsinq.f32 %v296_v54  ;;  %v546_v27 = vshll.u32 %v1254_v62, %v531_v11  ;;  %v547_v29 = vshrl.u32 %v1255_v7, %v532_v19  ;;  %v391_v59 = vand.u32 2147483647, %v390_v53 }
  0x7a   : > { %v477_v63 = vshll.u32 %v1538_v57, 30  ;;  %vm549_vm10 = vcmp.lt.s32.totalorder %v1493_v4, 1  ;;  %v554_v60 = vsel %vm552_vm8, %v542_v37, 2102212464  ;;  %v545_v0 = vor.u32 %v544_v49, %v543_v58 }
  0x7b   : > { %v548_v3 = vor.u32 %v547_v29, %v546_v27  ;;  %vm551_vm11 = vcmp.lt.s32.totalorder %v1493_v4, 3  ;;  %v713_v5 = vadd.s32 3, %v297_v10  ;;  %vm302_vm12 = vcmp.lt.s32.totalorder %v1504_v39, 2 }
  0x7c   : > { %v394_v6 = vmul.f32 %v393_v55, %v391_v59  ;;  %v1549_v9 = vsub.s32 %v474_v35, %v477_v63  ;;  %vm550_vm13 = vcmp.lt.s32.totalorder %v1493_v4, 2  ;;  %v553_v62 = vsel %vm549_vm10, %v533_v50, %v536_v47 }
  0x7d   : > { %v555_v7 = vsel %vm551_vm11, %v539_v22, %v554_v60  ;;  %v557_v48 = vsel %vm549_vm10, %v536_v47, %v539_v22  ;;  %v558_v11 = vsel %vm552_vm8, %v545_v0, 920167782  ;;  %v562_v10 = vsel %vm552_vm8, %v548_v3, 1326507024 }
  0x7e   : > { %v395_v16 = vxor.u32 2147483648, %v394_v6  ;;  %v480_v18 = vsub.s32 0, %v1549_v9  ;;  %v559_v19 = vsel %vm551_vm11, %v542_v37, %v558_v11  ;;  %v561_v20 = vsel %vm549_vm10, %v539_v22, %v542_v37 }
  0x7f   : > { %vm303_vm14 = vcmp.eq.s32.totalorder %v1504_v39, 0  ;;  %v400_v1 = vsel %vm1533_vm9, 0, %v1510_v17  ;;  %v563_v28 = vsel %vm551_vm11, %v545_v0, %v562_v10  ;;  %v714_v30 = vand.u32 3, %v713_v5 }
  0x80   : > { %vm300_vm15 = vweird.f32 %v1332_v21  ;;  %vm306_vm0 = vcmp.eq.s32.totalorder %v1504_v39, 2  ;;  %v396_v26 = vsel %vm313_vm4, %v395_v16, %v394_v6  ;;  %v1582_v31 = vand.u32 3, %v400_v1 }
  0x81   : > { %v1126_v12 = vmin.u32 %v480_v18, %v1549_v9  ;;  %vm207_vm1 = vcmp.gt.f32.partialorder %v1565_v38, 0.5  ;;  %v399_v17 = vsel %vm1533_vm9, %v1334_v23, %v396_v26  ;;  %v556_v52 = vsel %vm550_vm13, %v553_v62, %v555_v7 }
  0x82   : > { %v1194_v32 = vpop.eup %1193  ;;  %v560_v50 = vsel %vm550_vm13, %v557_v48, %v559_v19  ;;  %v564_v34 = vsel %vm550_vm13, %v561_v20, %v563_v28  ;;  %1197 = vcosq.f32 %v399_v17  ;;  %vm716_vm2 = vcmp.eq.s32.totalorder %v714_v30, 0 }
  0x83   : > { %v1196_v14 = vpop.eup %1195  ;;  %v307_v24 = vxor.u32 2147483648, %v1194_v32  ;;  %v482_v35 = vclz %v1126_v12  ;;  %1199 = vsinq.f32 %v399_v17  ;;  %v470_v56 = vadd.s32 %v1496_v8, %v1491_v61 }
  0x84   : > { %v304_v36 = vxor.u32 2147483648, %v1196_v14  ;;  %v1597_v40 = vmul.u32.u64.low %v1502_v13, %v564_v34  ;;  %v1598_v33 = vmul.u32.u64.high %v1502_v13, %v564_v34, %v1597_v40  ;;  %vm719_vm3 = vcmp.eq.s32.totalorder %v714_v30, 2 }
  0x85   : > { %v308_v41 = vsel %vm306_vm0, %v307_v24, %v1196_v14  ;;  %v1127_v51 = vadd.s32 4294967294, %v482_v35  ;;  %v1603_v4 = vmul.u32.u64.low %v1502_v13, %v560_v50  ;;  %v1604_v54 = vmul.u32.u64.high %v1502_v13, %v560_v50, %v1603_v4 }
  0x86   : > { %v305_v43 = vsel %vm303_vm14, %v1194_v32, %v304_v36  ;;  %v817_v44 = vadd.s32 3, %v400_v1  ;;  %v572_v45 = vmul.u32 %v1502_v13, %v556_v52  ;;  %vm715_vm5 = vcmp.lt.s32.totalorder %v714_v30, 2 }
  0x87   : > { %vm1128_vm4 = vcmp.lt.s32.totalorder %v1127_v51, 0  ;;  %v718_v47 = vsel %vm716_vm2, %v1194_v32, %v304_v36  ;;  %v309_v37 = vsel %vm302_vm12, %v305_v43, %v308_v41  ;;  %vm403_vm6 = vweird.f32 %v1334_v23 }
  0x88   : > { %v485_v61 = vsel %vm1128_vm4, 0, %v1127_v51  ;;  %vm574_vm7 = vc.u32 %v1598_v33, %v1603_v4  ;;  %v721_v8 = vsel %vm719_vm3, %v307_v24, %v1196_v14  ;;  %v575_v22 = vadd.s32 1, %v1604_v54 }
  0x89   : > { %v486_v58 = vsub.s32 32, %v485_v61  ;;  %v487_v53 = vshll.u32 %v1549_v9, %v485_v61  ;;  %v490_v55 = vsub.s32 4294967266, %v485_v61  ;;  %vm405_vm8 = vcmp.lt.s32.totalorder %v1582_v31, 2 }
  0x8a   : > { %vm406_vm9 = vcmp.eq.s32.totalorder %v1582_v31, 0  ;;  %v818_v13 = vand.u32 3, %v817_v44  ;;  %vm409_vm10 = vcmp.eq.s32.totalorder %v1582_v31, 2  ;;  %v576_v27 = vsel %vm574_vm7, %v575_v22, %v1604_v54 }
  0x8b   : > { %v488_v39 = vshrl.u32 %v470_v56, %v486_v58  ;;  %v491_v49 = vadd.s32 127, %v490_v55  ;;  %v310_v29 = vsel %vm300_vm15, nan, %v309_v37  ;;  %v500_v59 = vsub.s32 4, %v1538_v57 }
  0x8c   : > { %v577_v63 = vadd.s32 %v576_v27, %v572_v45  ;;  %v722_v60 = vsel %vm715_vm5, %v718_v47, %v721_v8  ;;  %v1198_v0 = vpop.eup %1197  ;;  %vm823_vm11 = vcmp.eq.s32.totalorder %v818_v13, 2  ;;  %v1256_v6 = vmov 0  }
  0x8d   : > { %v489_v3 = vor.u32 %v488_v39, %v487_v53  ;;  %v492_v5 = vshll.u32 %v491_v49, 23  ;;  %v1036_v9 = vsel %vm207_vm1, 1, %v1256_v6  ;;  %v1200_v62 = vpop.eup %1199  ;;  %v410_v7 = vxor.u32 2147483648, %v1198_v0 }
  0x8e   : > { %v578_v48 = vadd.s32 536870912, %v577_v63  ;;  %vm820_vm12 = vcmp.eq.s32.totalorder %v818_v13, 0  ;;  %v1039_v11 = vsub.s32 0, %v1323_v2  ;;  %v407_v10 = vxor.u32 2147483648, %v1200_v62 }
  0x8f   : > { %v493_v16 = vor.u32 4788187, %v492_v5  ;;  %v496_v18 = vcvt.s32.f32 %v489_v3  ;;  %vm819_vm13 = vcmp.lt.s32.totalorder %v818_v13, 2  ;;  %v411_v19 = vsel %vm409_vm10, %v410_v7, %v1200_v62 }
  0x90   : > { %v1646_v20 = vshrl.u32 %v578_v48, 30  ;;  %v825_v1 = vsel %vm823_vm11, %v410_v7, %v1200_v62  ;;  %v1648_v28 = vrot.slane %v1036_v9, %v1039_v11  ;;  %v408_v38 = vsel %vm406_vm9, %v1198_v0, %v407_v10 }
  0x91   : > { %v494_v30 = vand.u32 2147483647, %v493_v16  ;;  %v723_v2 = vsel %vm300_vm15, nan, %v722_v60  ;;  %v822_v26 = vsel %vm820_vm12, %v1198_v0, %v407_v10  ;;  %v412_v12 = vsel %vm405_vm8, %v408_v38, %v411_v19 }
  0x92   : > { %v580_v32 = vshll.u32 %v1646_v20, 30  ;;  %v826_v17 = vsel %vm819_vm13, %v822_v26, %v825_v1  ;;  %v413_v52 = vsel %vm403_vm6, nan, %v412_v12  ;;  %vm1041_vm14 = vcmp.eq.s32.totalorder %v1648_v28, 1 }
  0x93   : > { %v497_v50 = vmul.f32 %v496_v18, %v494_v30  ;;  %v827_v21 = vsel %vm403_vm6, nan, %v826_v17  ;;  %vm416_vm15 = vcmp.lt.s32.totalorder %v1337_v25, 0  ;;  %v1042_v31 = vsel %vm1041_vm14, %v310_v29, %v723_v2 }
  0x94   : > { %v581_v34 = vsub.s32 %v577_v63, %v580_v32  ;;  %v1043_v14 = vsel %vm1041_vm14, %v413_v52, %v827_v21  ;;  %vm415_vm0 = vcmp.le.f32.partialorder %v414_v42, 0.7853982  ;;  %v501_v35 = vsel %vm416_vm15, %v500_v59, %v1538_v57  ;;  %1046 = vst [vmem:[%s1657_s13] sm:$0xff] %v1042_v31 }
  0x95   : > { %v498_v24 = vxor.u32 2147483648, %v497_v50  ;;  %1047 = vst [vmem:[%s1657_s13 + $0x8] sm:$0xff] %v1043_v14  ;;  %v503_v41 = vsel %vm415_vm0, 0, %v501_v35  ;;  %v573_v44 = vadd.s32 %v1603_v4, %v1598_v33  ;;  %vm506_vm6 = vweird.f32 %v1337_v25 }
  0x96   : > { %v583_v23 = vsub.s32 0, %v581_v34  ;;  %v921_v43 = vadd.s32 3, %v503_v41  ;;  %v507_v42 = vand.u32 3, %v503_v41  ;;  %v603_v3 = vsub.s32 4, %v1646_v20 }
  0x97   : > { %v499_v36 = vsel %vm416_vm15, %v498_v24, %v497_v50  ;;  %vm519_vm9 = vcmp.lt.s32.totalorder %v1348_v46, 0  ;;  %vm518_vm10 = vcmp.le.f32.partialorder %v517_v15, 0.7853982 }
  0x98   : > { %v502_v40 = vsel %vm415_vm0, %v1337_v25, %v499_v36  ;;  %v1130_v51 = vmin.u32 %v583_v23, %v581_v34  ;;  %v922_v57 = vand.u32 3, %v921_v43  ;;  %vm509_vm2 = vcmp.eq.s32.totalorder %v507_v42, 0 }
  0x99   : > { %1201 = vcosq.f32 %v502_v40  ;;  %vm512_vm3 = vcmp.eq.s32.totalorder %v507_v42, 2  ;;  %vm508_vm7 = vcmp.lt.s32.totalorder %v507_v42, 2  ;;  %v604_v48 = vsel %vm519_vm9, %v603_v3, %v1646_v20 }
  0x9a   : > { %1203 = vsinq.f32 %v502_v40  ;;  %v585_v54 = vclz %v1130_v51  ;;  %vm927_vm4 = vcmp.eq.s32.totalorder %v922_v57, 2  ;;  %vm924_vm5 = vcmp.eq.s32.totalorder %v922_v57, 0 }
  0x9b   : > { %vm923_vm8 = vcmp.lt.s32.totalorder %v922_v57, 2  ;;  %v606_v16 = vsel %vm518_vm10, 0, %v604_v48 }
  0x9c   : > { %v1131_v56 = vadd.s32 4294967294, %v585_v54  ;;  %v1025_v18 = vadd.s32 3, %v606_v16  ;;  %v610_v19 = vand.u32 3, %v606_v16 }
  0x9e   : > { %vm1132_vm1 = vcmp.lt.s32.totalorder %v1131_v56, 0  ;;  %v1026_v1 = vand.u32 3, %v1025_v18  ;;  %vm615_vm11 = vcmp.eq.s32.totalorder %v610_v19, 2  ;;  %vm612_vm13 = vcmp.eq.s32.totalorder %v610_v19, 0 }
  0x9f   : > { %v588_v45 = vsel %vm1132_vm1, 0, %v1131_v56  ;;  %vm611_vm0 = vcmp.lt.s32.totalorder %v610_v19, 2 }
  0xa0   : > { %v589_v47 = vsub.s32 32, %v588_v45  ;;  %v590_v37 = vshll.u32 %v581_v34, %v588_v45  ;;  %v593_v61 = vsub.s32 4294967266, %v588_v45  ;;  %vm1031_vm12 = vcmp.eq.s32.totalorder %v1026_v1, 2 }
  0xa1   : > { %vm1028_vm15 = vcmp.eq.s32.totalorder %v1026_v1, 0  ;;  %vm1027_vm1 = vcmp.lt.s32.totalorder %v1026_v1, 2 }
  0xa2   : > { %v591_v8 = vshrl.u32 %v573_v44, %v589_v47  ;;  %v594_v58 = vadd.s32 127, %v593_v61 }
  0xa3   : > { %v1202_v53 = vpop.eup %1201 }
  0xa4   : > { %v1204_v55 = vpop.eup %1203  ;;  %v513_v22 = vxor.u32 2147483648, %v1202_v53  ;;  %v592_v13 = vor.u32 %v591_v8, %v590_v37  ;;  %v595_v39 = vshll.u32 %v594_v58, 23 }
  0xa5   : > { %v510_v33 = vxor.u32 2147483648, %v1204_v55 }
  0xa6   : > { %v514_v4 = vsel %vm512_vm3, %v513_v22, %v1204_v55  ;;  %v596_v49 = vor.u32 4788187, %v595_v39  ;;  %v599_v27 = vcvt.s32.f32 %v592_v13  ;;  %v929_v29 = vsel %vm927_vm4, %v513_v22, %v1204_v55 }
  0xa7   : > { %v511_v59 = vsel %vm509_vm2, %v1202_v53, %v510_v33  ;;  %v926_v63 = vsel %vm924_vm5, %v1202_v53, %v510_v33  ;;  %vm609_vm2 = vweird.f32 %v1348_v46 }
  0xa8   : > { %v515_v60 = vsel %vm508_vm7, %v511_v59, %v514_v4  ;;  %v597_v0 = vand.u32 2147483647, %v596_v49  ;;  %v930_v5 = vsel %vm923_vm8, %v926_v63, %v929_v29 }
  0xa9   : > { %v516_v6 = vsel %vm506_vm6, nan, %v515_v60  ;;  %v931_v9 = vsel %vm506_vm6, nan, %v930_v5 }
  0xaa   : > { %v600_v62 = vmul.f32 %v599_v27, %v597_v0  ;;  %v1044_v25 = vsel %vm1041_vm14, %v516_v6, %v931_v9 }
  0xab   : > { %1048 = vst [vmem:[%s1657_s13 + $0x10] sm:$0xff] %v1044_v25 }
  0xac   : > { %v601_v7 = vxor.u32 2147483648, %v600_v62 }
  0xae   : > { %v602_v11 = vsel %vm519_vm9, %v601_v7, %v600_v62 }
  0xaf   : > { %v605_v10 = vsel %vm518_vm10, %v1348_v46, %v602_v11 }
  0xb0   : > { %1205 = vcosq.f32 %v605_v10 }
  0xb1   : > { %1207 = vsinq.f32 %v605_v10 }
  0xba   : > { %v1206_v38 = vpop.eup %1205 }
  0xbb   : > { %v1208_v30 = vpop.eup %1207  ;;  %v616_v2 = vxor.u32 2147483648, %v1206_v38 }
  0xbc   : > { %v613_v15 = vxor.u32 2147483648, %v1208_v30 }
  0xbd   : > { %v617_v20 = vsel %vm615_vm11, %v616_v2, %v1208_v30  ;;  %v1033_v26 = vsel %vm1031_vm12, %v616_v2, %v1208_v30 }
  0xbe   : > { %v614_v12 = vsel %vm612_vm13, %v1206_v38, %v613_v15  ;;  %v1030_v32 = vsel %vm1028_vm15, %v1206_v38, %v613_v15 }
  0xbf   : > { %v618_v17 = vsel %vm611_vm0, %v614_v12, %v617_v20  ;;  %v1034_v52 = vsel %vm1027_vm1, %v1030_v32, %v1033_v26 }
  0xc0   : > { %v619_v50 = vsel %vm609_vm2, nan, %v618_v17  ;;  %v1035_v21 = vsel %vm609_vm2, nan, %v1034_v52 }
  0xc1   : > { %v1045_v34 = vsel %vm1041_vm14, %v619_v50, %v1035_v21 }
  0xc2   : > { %1049 = vst [vmem:[%s1657_s13 + $0x18] sm:$0xff] %v1045_v34 }
  0xc3 PF: > { %s14_s12 = sadd.s32 1, %s1247_s12  }
  0xc4   : > { %p11_p3 = scmp.ge.s32.totalorder %s14_s12, 4  }
  0xc6   :  { %13 = sbr.rel (!%p11_p3) target bundleno = 1 (0x1), region = 64 }
  0xcd   :  { %1072 = vsyncpa [#allocation3], 1 }
  0xce   :  { %1074 = vsyncpa [#allocation3 + $0x1], 1 }

</bundles_post_ra>
